<compile_context>
chip_gen: v5e
topology: v5e:2x2
jax: 0.10.0
libtpu: 0.0.40
codegen_flags: <defaults>
</compile_context>

<pallas_src>
import functools

import jax
import jax.numpy as jnp
from jax.experimental import pallas as pl
from jax.experimental.pallas import tpu as pltpu

_LANE = 128
_SUBLANE = 8
_TARGET_BLOCK_BYTES = 2 * 1024 * 1024   # per input, per grid step
_MAX_COL_CHUNKS = 256                   # cap on unrolled 128-lane chunks/step


def _nmse_kernel(pred_ref, label_ref, out_ref, num_acc, den_acc, *,
                 tn, tail_len, ncols):
    """Grid = (batch_tiles, col_tiles); the column axis is the reduction axis.

    pred_ref / label_ref : VMEM (tb, tn) input tiles
    out_ref              : VMEM (tb, 1) per-sample NMSE (written in epilogue)
    num_acc / den_acc    : VMEM (tb, 128) f32 lane-dense partial sums
    tail_len             : static number of valid columns in the LAST column
                           tile (== tn when n % tn == 0)
    """
    col = pl.program_id(1)

    @pl.when(col == 0)
    def _init():
        num_acc[...] = jnp.zeros_like(num_acc)
        den_acc[...] = jnp.zeros_like(den_acc)

    nchunks = tn // _LANE

    def _accumulate(valid_cols):
        # Fold the static 128-lane chunks of this tile into (tb, 128) register
        # partials (pure VPU work that hides under the input DMA); a single
        # accumulator "+=" at the end keeps accumulator vst/vld traffic to one
        # per step.  Chunks entirely past `valid_cols` are skipped; only the
        # one straddling chunk gets an iota mask.
        num_part = None
        den_part = None
        for c in range(nchunks):
            lo = c * _LANE
            if lo >= valid_cols:
                break
            p = pred_ref[:, lo:lo + _LANE].astype(jnp.float32)
            l = label_ref[:, lo:lo + _LANE].astype(jnp.float32)
            if lo + _LANE > valid_cols:          # partially valid chunk
                lane = jax.lax.broadcasted_iota(jnp.int32, p.shape, 1)
                keep = lane < (valid_cols - lo)
                p = jnp.where(keep, p, 0.0)
                l = jnp.where(keep, l, 0.0)
            d = p - l
            nc = d * d
            dc = l * l
            num_part = nc if num_part is None else num_part + nc
            den_part = dc if den_part is None else den_part + dc
        num_acc[...] += num_part
        den_acc[...] += den_part

    if tail_len == tn:
        _accumulate(tn)                          # no ragged tail anywhere
    elif ncols == 1:
        _accumulate(tail_len)                    # single (ragged) column tile
    else:
        @pl.when(col < ncols - 1)
        def _body_full():
            _accumulate(tn)                      # unmasked steady-state body

        @pl.when(col == ncols - 1)
        def _body_tail():
            _accumulate(tail_len)                # masked tail-only body

    @pl.when(col == ncols - 1)
    def _finalize():
        num = jnp.sum(num_acc[...], axis=1, keepdims=True)   # XLU, once/tile
        den = jnp.sum(den_acc[...], axis=1, keepdims=True)
        out_ref[...] = num / den


def _tile_sizes(batch, n, itemsize):
    """Pick (tb, tn): ~2 MiB per input block, layout-legal, and >= 2 batch
    tiles whenever B >= 16 so v7x can megacore-shard the 'parallel' axis."""
    sub = max(_SUBLANE, 32 // itemsize)          # 8 f32 / 16 bf16 / 32 int8
    n128 = pl.cdiv(n, _LANE) * _LANE
    tn_cap = min(_MAX_COL_CHUNKS * _LANE,
                 max(_LANE, ((_TARGET_BLOCK_BYTES // (sub * itemsize))
                             // _LANE) * _LANE))
    tn = min(n128, tn_cap)                       # always a multiple of 128
    desired_tb = max(sub, _TARGET_BLOCK_BYTES // (tn * itemsize))
    if desired_tb >= batch:
        tb = batch                               # full batch dim: always legal
        if batch >= 16:
            # keep the batch ("parallel") axis >= 2 tiles for 2-TC chips
            half = (pl.cdiv(batch, 2) // sub) * sub
            if sub <= half < batch:
                tb = half
    else:
        tb = max(sub, (desired_tb // sub) * sub)  # multiple of sublane packing
    return tb, tn


def _vmem_limit_bytes(tb, tn, itemsize):
    inputs = 2 * 2 * tb * tn * itemsize          # 2 inputs x double buffer
    accs = 2 * tb * _LANE * 4                    # (tb, 128) f32 accumulators
    outs = 2 * tb * 4                            # (tb, 1) f32 out, 2 buffers
    need = inputs + accs + outs
    # Generous headroom for pipeline-internal scratch while staying within
    # every generation's scoped-VMEM ceiling (v7x scoped default: 32 MiB).
    return int(min(max(2 * need, 16 * 1024 * 1024), 30 * 1024 * 1024))


@jax.jit
def nmse_loss(h_predict, h_label):
    assert h_predict.shape == h_label.shape
    B = h_predict.shape[0]

    # Contiguous reshape: no extra HBM traffic, no wrapper-side padding.
    pred = h_predict.reshape(B, -1)
    label = h_label.reshape(B, -1)
    n = pred.shape[1]

    tb, tn = _tile_sizes(B, n, pred.dtype.itemsize)
    grid = (pl.cdiv(B, tb), pl.cdiv(n, tn))
    ncols = grid[1]
    tail_len = n - (ncols - 1) * tn              # valid cols in last col tile

    kernel = functools.partial(_nmse_kernel, tn=tn, tail_len=tail_len,
                               ncols=ncols)

    per_sample = pl.pallas_call(
        kernel,
        out_shape=jax.ShapeDtypeStruct((B, 1), jnp.float32),
        grid_spec=pltpu.PrefetchScalarGridSpec(
            num_scalar_prefetch=0,
            grid=grid,
            in_specs=[
                pl.BlockSpec((tb, tn), lambda b, c: (b, c)),
                pl.BlockSpec((tb, tn), lambda b, c: (b, c)),
            ],
            out_specs=pl.BlockSpec((tb, 1), lambda b, c: (b, 0)),
            scratch_shapes=[
                pltpu.VMEM((tb, _LANE), jnp.float32),
                pltpu.VMEM((tb, _LANE), jnp.float32),
            ],
        ),
        compiler_params=pltpu.CompilerParams(
            dimension_semantics=("parallel", "arbitrary"),
            vmem_limit_bytes=_vmem_limit_bytes(tb, tn, pred.dtype.itemsize),
        ),
        cost_estimate=pl.CostEstimate(
            flops=5 * B * n,
            transcendentals=0,
            bytes_accessed=2 * B * n * pred.dtype.itemsize + B * 4,
        ),
    )(pred, label)

    return jnp.mean(per_sample[:, 0])


def nmse_loss_ref(h_predict, h_label):
    B = h_predict.shape[0]
    p = h_predict.reshape(B, -1).astype(jnp.float32)
    l = h_label.reshape(B, -1).astype(jnp.float32)
    num = jnp.sum((p - l) ** 2, axis=1)
    den = jnp.sum(l ** 2, axis=1)
    return jnp.mean(num / den)


if __name__ == "__main__":
    key = jax.random.PRNGKey(0)
    k1, k2, k3, k4, k5, k6 = jax.random.split(key, 6)

    # 1) Module-typical small shape: NCHW batch=2, channels=4, spatial=16x16.
    h_predict = jax.random.normal(k1, (2, 4, 16, 16), dtype=jnp.float32)
    h_label = jax.random.normal(k2, (2, 4, 16, 16), dtype=jnp.float32)
    loss = nmse_loss(h_predict, h_label)
    jax.block_until_ready(loss)
    ref = nmse_loss_ref(h_predict, h_label)
    assert jnp.allclose(loss, ref, rtol=1e-5, atol=1e-6), (loss, ref)

    # 2) Ragged lane tail within a single column tile (n = 35, masked chunk).
    p2 = jax.random.normal(k3, (3, 5, 7), dtype=jnp.float32)
    l2 = jax.random.normal(k4, (3, 5, 7), dtype=jnp.float32)
    loss2 = nmse_loss(p2, l2)
    jax.block_until_ready(loss2)
    ref2 = nmse_loss_ref(p2, l2)
    assert jnp.allclose(loss2, ref2, rtol=1e-5, atol=1e-6), (loss2, ref2)

    # 3) Multi-column-tile reduction with a ragged column tail AND a ragged
    #    last batch tile (B=18 -> tb=16, n=33000 -> 2 column tiles).
    p3 = jax.random.normal(k5, (18, 33000), dtype=jnp.float32)
    l3 = jax.random.normal(k6, (18, 33000), dtype=jnp.float32)
    loss3 = nmse_loss(p3, l3)
    jax.block_until_ready(loss3)
    ref3 = nmse_loss_ref(p3, l3)
    assert jnp.allclose(loss3, ref3, rtol=1e-4, atol=1e-6), (loss3, ref3)

    print("KERNEL_OK")
</pallas_src>

<mosaic_0001>
module attributes {stable_mosaic.version = 11 : i64} {
  func.func @_nmse_kernel(%arg0: i32, %arg1: i32, %arg2: memref<2x1024xf32, #tpu.memory_space<vmem>>, %arg3: memref<2x1024xf32, #tpu.memory_space<vmem>>, %arg4: memref<2x1xf32, #tpu.memory_space<vmem>>, %arg5: memref<2x128xf32, #tpu.memory_space<vmem>>, %arg6: memref<2x128xf32, #tpu.memory_space<vmem>>) attributes {dimension_semantics = [#tpu.dimension_semantics<parallel>, #tpu.dimension_semantics<arbitrary>], iteration_bounds = array<i64: 1, 1>, scalar_prefetch = 0 : i64, scratch_operands = 2 : i64, tpu.core_type = #tpu.core_type<tc>, window_params = [{transform_indices = @transform_0, window_bounds = array<i64: 2, 1024>}, {transform_indices = @transform_1, window_bounds = array<i64: 2, 1024>}, {transform_indices = @transform_2, window_bounds = array<i64: 2, 1>}]} {
    %c0_i32 = arith.constant 0 : i32
    %0 = arith.cmpi eq, %arg1, %c0_i32 : i32
    %1 = arith.extui %0 : i1 to i32
    %c0_i32_0 = arith.constant 0 : i32
    %2 = arith.cmpi ne, %1, %c0_i32_0 : i32
    scf.if %2 {
      %cst = arith.constant 0.000000e+00 : f32
      %66 = vector.broadcast %cst : f32 to vector<2x128xf32>
      %c0_35 = arith.constant 0 : index
      %c0_36 = arith.constant 0 : index
      %67 = vector.load %arg5[%c0_35, %c0_36] : memref<2x128xf32, #tpu.memory_space<vmem>>, vector<2x128xf32>
      tpu.vector_store %arg5[%c0_35, %c0_36], %66 {strides = array<i32>} : memref<2x128xf32, #tpu.memory_space<vmem>>, vector<2x128xf32>,
      %cst_37 = arith.constant 0.000000e+00 : f32
      %68 = vector.broadcast %cst_37 : f32 to vector<2x128xf32>
      %c0_38 = arith.constant 0 : index
      %c0_39 = arith.constant 0 : index
      %69 = vector.load %arg6[%c0_38, %c0_39] : memref<2x128xf32, #tpu.memory_space<vmem>>, vector<2x128xf32>
      tpu.vector_store %arg6[%c0_38, %c0_39], %68 {strides = array<i32>} : memref<2x128xf32, #tpu.memory_space<vmem>>, vector<2x128xf32>,
    } else {
    }
    %c0 = arith.constant 0 : index
    %c0_1 = arith.constant 0 : index
    %3 = vector.load %arg2[%c0, %c0_1] : memref<2x1024xf32, #tpu.memory_space<vmem>>, vector<2x128xf32>
    %c0_2 = arith.constant 0 : index
    %c0_3 = arith.constant 0 : index
    %4 = vector.load %arg3[%c0_2, %c0_3] : memref<2x1024xf32, #tpu.memory_space<vmem>>, vector<2x128xf32>
    %5 = arith.subf %3, %4 : vector<2x128xf32>
    %6 = arith.mulf %5, %5 : vector<2x128xf32>
    %7 = arith.mulf %4, %4 : vector<2x128xf32>
    %c0_4 = arith.constant 0 : index
    %c128 = arith.constant 128 : index
    %8 = vector.load %arg2[%c0_4, %c128] : memref<2x1024xf32, #tpu.memory_space<vmem>>, vector<2x128xf32>
    %c0_5 = arith.constant 0 : index
    %c128_6 = arith.constant 128 : index
    %9 = vector.load %arg3[%c0_5, %c128_6] : memref<2x1024xf32, #tpu.memory_space<vmem>>, vector<2x128xf32>
    %10 = arith.subf %8, %9 : vector<2x128xf32>
    %11 = arith.mulf %10, %10 : vector<2x128xf32>
    %12 = arith.mulf %9, %9 : vector<2x128xf32>
    %13 = arith.addf %6, %11 : vector<2x128xf32>
    %14 = arith.addf %7, %12 : vector<2x128xf32>
    %c0_7 = arith.constant 0 : index
    %c256 = arith.constant 256 : index
    %15 = vector.load %arg2[%c0_7, %c256] : memref<2x1024xf32, #tpu.memory_space<vmem>>, vector<2x128xf32>
    %c0_8 = arith.constant 0 : index
    %c256_9 = arith.constant 256 : index
    %16 = vector.load %arg3[%c0_8, %c256_9] : memref<2x1024xf32, #tpu.memory_space<vmem>>, vector<2x128xf32>
    %17 = arith.subf %15, %16 : vector<2x128xf32>
    %18 = arith.mulf %17, %17 : vector<2x128xf32>
    %19 = arith.mulf %16, %16 : vector<2x128xf32>
    %20 = arith.addf %13, %18 : vector<2x128xf32>
    %21 = arith.addf %14, %19 : vector<2x128xf32>
    %c0_10 = arith.constant 0 : index
    %c384 = arith.constant 384 : index
    %22 = vector.load %arg2[%c0_10, %c384] : memref<2x1024xf32, #tpu.memory_space<vmem>>, vector<2x128xf32>
    %c0_11 = arith.constant 0 : index
    %c384_12 = arith.constant 384 : index
    %23 = vector.load %arg3[%c0_11, %c384_12] : memref<2x1024xf32, #tpu.memory_space<vmem>>, vector<2x128xf32>
    %24 = arith.subf %22, %23 : vector<2x128xf32>
    %25 = arith.mulf %24, %24 : vector<2x128xf32>
    %26 = arith.mulf %23, %23 : vector<2x128xf32>
    %27 = arith.addf %20, %25 : vector<2x128xf32>
    %28 = arith.addf %21, %26 : vector<2x128xf32>
    %c0_13 = arith.constant 0 : index
    %c512 = arith.constant 512 : index
    %29 = vector.load %arg2[%c0_13, %c512] : memref<2x1024xf32, #tpu.memory_space<vmem>>, vector<2x128xf32>
    %c0_14 = arith.constant 0 : index
    %c512_15 = arith.constant 512 : index
    %30 = vector.load %arg3[%c0_14, %c512_15] : memref<2x1024xf32, #tpu.memory_space<vmem>>, vector<2x128xf32>
    %31 = arith.subf %29, %30 : vector<2x128xf32>
    %32 = arith.mulf %31, %31 : vector<2x128xf32>
    %33 = arith.mulf %30, %30 : vector<2x128xf32>
    %34 = arith.addf %27, %32 : vector<2x128xf32>
    %35 = arith.addf %28, %33 : vector<2x128xf32>
    %c0_16 = arith.constant 0 : index
    %c640 = arith.constant 640 : index
    %36 = vector.load %arg2[%c0_16, %c640] : memref<2x1024xf32, #tpu.memory_space<vmem>>, vector<2x128xf32>
    %c0_17 = arith.constant 0 : index
    %c640_18 = arith.constant 640 : index
    %37 = vector.load %arg3[%c0_17, %c640_18] : memref<2x1024xf32, #tpu.memory_space<vmem>>, vector<2x128xf32>
    %38 = arith.subf %36, %37 : vector<2x128xf32>
    %39 = arith.mulf %38, %38 : vector<2x128xf32>
    %40 = arith.mulf %37, %37 : vector<2x128xf32>
    %41 = arith.addf %34, %39 : vector<2x128xf32>
    %42 = arith.addf %35, %40 : vector<2x128xf32>
    %c0_19 = arith.constant 0 : index
    %c768 = arith.constant 768 : index
    %43 = vector.load %arg2[%c0_19, %c768] : memref<2x1024xf32, #tpu.memory_space<vmem>>, vector<2x128xf32>
    %c0_20 = arith.constant 0 : index
    %c768_21 = arith.constant 768 : index
    %44 = vector.load %arg3[%c0_20, %c768_21] : memref<2x1024xf32, #tpu.memory_space<vmem>>, vector<2x128xf32>
    %45 = arith.subf %43, %44 : vector<2x128xf32>
    %46 = arith.mulf %45, %45 : vector<2x128xf32>
    %47 = arith.mulf %44, %44 : vector<2x128xf32>
    %48 = arith.addf %41, %46 : vector<2x128xf32>
    %49 = arith.addf %42, %47 : vector<2x128xf32>
    %c0_22 = arith.constant 0 : index
    %c896 = arith.constant 896 : index
    %50 = vector.load %arg2[%c0_22, %c896] : memref<2x1024xf32, #tpu.memory_space<vmem>>, vector<2x128xf32>
    %c0_23 = arith.constant 0 : index
    %c896_24 = arith.constant 896 : index
    %51 = vector.load %arg3[%c0_23, %c896_24] : memref<2x1024xf32, #tpu.memory_space<vmem>>, vector<2x128xf32>
    %52 = arith.subf %50, %51 : vector<2x128xf32>
    %53 = arith.mulf %52, %52 : vector<2x128xf32>
    %54 = arith.mulf %51, %51 : vector<2x128xf32>
    %55 = arith.addf %48, %53 : vector<2x128xf32>
    %56 = arith.addf %49, %54 : vector<2x128xf32>
    %c0_25 = arith.constant 0 : index
    %c0_26 = arith.constant 0 : index
    %57 = vector.load %arg5[%c0_25, %c0_26] : memref<2x128xf32, #tpu.memory_space<vmem>>, vector<2x128xf32>
    %58 = arith.addf %57, %55 : vector<2x128xf32>
    %c0_27 = arith.constant 0 : index
    %c0_28 = arith.constant 0 : index
    %59 = vector.load %arg5[%c0_27, %c0_28] : memref<2x128xf32, #tpu.memory_space<vmem>>, vector<2x128xf32>
    tpu.vector_store %arg5[%c0_27, %c0_28], %58 {strides = array<i32>} : memref<2x128xf32, #tpu.memory_space<vmem>>, vector<2x128xf32>,
    %c0_29 = arith.constant 0 : index
    %c0_30 = arith.constant 0 : index
    %60 = vector.load %arg6[%c0_29, %c0_30] : memref<2x128xf32, #tpu.memory_space<vmem>>, vector<2x128xf32>
    %61 = arith.addf %60, %56 : vector<2x128xf32>
    %c0_31 = arith.constant 0 : index
    %c0_32 = arith.constant 0 : index
    %62 = vector.load %arg6[%c0_31, %c0_32] : memref<2x128xf32, #tpu.memory_space<vmem>>, vector<2x128xf32>
    tpu.vector_store %arg6[%c0_31, %c0_32], %61 {strides = array<i32>} : memref<2x128xf32, #tpu.memory_space<vmem>>, vector<2x128xf32>,
    %c0_i32_33 = arith.constant 0 : i32
    %63 = arith.cmpi eq, %arg1, %c0_i32_33 : i32
    %64 = arith.extui %63 : i1 to i32
    %c0_i32_34 = arith.constant 0 : i32
    %65 = arith.cmpi ne, %64, %c0_i32_34 : i32
    scf.if %65 {
      %c0_35 = arith.constant 0 : index
      %c0_36 = arith.constant 0 : index
      %66 = vector.load %arg5[%c0_35, %c0_36] : memref<2x128xf32, #tpu.memory_space<vmem>>, vector<2x128xf32>
      %cst = arith.constant dense<0.000000e+00> : vector<2xf32>
      %67 = vector.multi_reduction <add>, %66, %cst [1] : vector<2x128xf32> to vector<2xf32>
      %68 = vector.shape_cast %67 : vector<2xf32> to vector<2x1xf32>
      %c0_37 = arith.constant 0 : index
      %c0_38 = arith.constant 0 : index
      %69 = vector.load %arg6[%c0_37, %c0_38] : memref<2x128xf32, #tpu.memory_space<vmem>>, vector<2x128xf32>
      %cst_39 = arith.constant dense<0.000000e+00> : vector<2xf32>
      %70 = vector.multi_reduction <add>, %69, %cst_39 [1] : vector<2x128xf32> to vector<2xf32>
      %71 = vector.shape_cast %70 : vector<2xf32> to vector<2x1xf32>
      %72 = arith.divf %68, %71 : vector<2x1xf32>
      %c0_40 = arith.constant 0 : index
      %c0_41 = arith.constant 0 : index
      %73 = vector.load %arg4[%c0_40, %c0_41] : memref<2x1xf32, #tpu.memory_space<vmem>>, vector<2x1xf32>
      tpu.vector_store %arg4[%c0_40, %c0_41], %72 {strides = array<i32>} : memref<2x1xf32, #tpu.memory_space<vmem>>, vector<2x1xf32>,
    } else {
    }
    return
  }
  func.func @transform_0(%arg0: i32, %arg1: i32) -> (i32, i32) {
    %c0_i32 = arith.constant 0 : i32
    return %arg0, %arg1 : i32, i32
  }
  func.func @transform_1(%arg0: i32, %arg1: i32) -> (i32, i32) {
    %c0_i32 = arith.constant 0 : i32
    return %arg0, %arg1 : i32, i32
  }
  func.func @transform_2(%arg0: i32, %arg1: i32) -> (i32, i32) {
    %c0_i32 = arith.constant 0 : i32
    %c0_i32_0 = arith.constant 0 : i32
    return %arg0, %c0_i32 : i32, i32
  }
}

</mosaic_0001>

<bundles_post_ra>
// kernel: nmse_loss.1
= control target key start
LH: loop header
LB: loop body
LE: loop exit
PB: predicated region body
PF: predicated region fallthrough
CT: control target
= control target key end

     0   :  { %v113_v0 = vmov 0.0   ;;  %vm81_vm0 = vcmask 1041408   ;;  %vm104_vm5 = vcmask 1024   ;;  %s180_s1 = inlined_call_operand.vmem [shape: f32[2,1024], index: 1, kind: input, shape index: {}]   ;;  %s181_s0 = inlined_call_operand.vmem [shape: f32[2,1024], index: 0, kind: input, shape index: {}]   ;;  %s182_s2 = inlined_call_operand.vmem [shape: f32[2,1], index: 2, kind: output, shape index: {}]  }
   0x1   :  { %16 = vst [vmem:[#allocation3] sm:$0x3] %v113_v0  ;;  %v18_v1 = vld [vmem:[%s180_s1] sm:$0x3]  ;;  %v23_v2 = vld [vmem:[%s180_s1 + $0x2] sm:$0x3] }
   0x2   :  { %v21_v3 = vmul.f32 %v18_v1, %v18_v1  ;;  %v26_v4 = vmul.f32 %v23_v2, %v23_v2  ;;  %v30_v5 = vld [vmem:[%s180_s1 + $0x4] sm:$0x3]  ;;  %v37_v6 = vld [vmem:[%s180_s1 + $0x6] sm:$0x3]  ;;  %v44_v8 = vld [vmem:[%s180_s1 + $0x8] sm:$0x3] }
   0x3   :  { %v33_v7 = vmul.f32 %v30_v5, %v30_v5  ;;  %v51_v9 = vld [vmem:[%s180_s1 + $0xa] sm:$0x3]  ;;  %v40_v11 = vmul.f32 %v37_v6, %v37_v6  ;;  %15 = vst [vmem:[#allocation2] sm:$0x3] %v113_v0  ;;  %v17_v12 = vld [vmem:[%s181_s0] sm:$0x3]  ;;  %v47_v20 = vmul.f32 %v44_v8, %v44_v8 }
   0x4   :  { %v28_v10 = vadd.f32 %v26_v4, %v21_v3  ;;  %v22_v13 = vld [vmem:[%s181_s0 + $0x2] sm:$0x3]  ;;  %v19_v14 = vsub.f32 %v17_v12, %v18_v1  ;;  %v29_v16 = vld [vmem:[%s181_s0 + $0x4] sm:$0x3]  ;;  %v36_v17 = vld [vmem:[%s181_s0 + $0x6] sm:$0x3]  ;;  %v54_v29 = vmul.f32 %v51_v9, %v51_v9 }
   0x5   :  { %v24_v15 = vsub.f32 %v22_v13, %v23_v2  ;;  %v43_v18 = vld [vmem:[%s181_s0 + $0x8] sm:$0x3]  ;;  %v31_v21 = vsub.f32 %v29_v16, %v30_v5  ;;  %v38_v22 = vsub.f32 %v36_v17, %v37_v6  ;;  %v50_v23 = vld [vmem:[%s181_s0 + $0xa] sm:$0x3]  ;;  %v58_v24 = vld [vmem:[%s180_s1 + $0xc] sm:$0x3] }
   0x6   :  { %v35_v19 = vadd.f32 %v33_v7, %v28_v10  ;;  %v20_v25 = vmul.f32 %v19_v14, %v19_v14  ;;  %v45_v27 = vsub.f32 %v43_v18, %v44_v8  ;;  %v57_v31 = vld [vmem:[%s181_s0 + $0xc] sm:$0x3]  ;;  %v65_v32 = vld [vmem:[%s180_s1 + $0xe] sm:$0x3]  ;;  %v52_v35 = vsub.f32 %v50_v23, %v51_v9 }
   0x7   :  { %v25_v26 = vmul.f32 %v24_v15, %v24_v15  ;;  %v32_v30 = vmul.f32 %v31_v21, %v31_v21  ;;  %v39_v34 = vmul.f32 %v38_v22, %v38_v22  ;;  %v61_v37 = vmul.f32 %v58_v24, %v58_v24  ;;  %v64_v38 = vld [vmem:[%s181_s0 + $0xe] sm:$0x3] }
   0x8   :  { %v42_v28 = vadd.f32 %v40_v11, %v35_v19  ;;  %v46_v40 = vmul.f32 %v45_v27, %v45_v27  ;;  %v59_v41 = vsub.f32 %v57_v31, %v58_v24  ;;  %v68_v43 = vmul.f32 %v65_v32, %v65_v32  ;;  %v74_v48 = vld [vmem:[#allocation3] sm:$0x3] }
   0x9   :  { %v27_v33 = vadd.f32 %v25_v26, %v20_v25  ;;  %v53_v45 = vmul.f32 %v52_v35, %v52_v35  ;;  %v66_v46 = vsub.f32 %v64_v38, %v65_v32 }
   0xa   :  { %v49_v36 = vadd.f32 %v47_v20, %v42_v28  ;;  %v60_v50 = vmul.f32 %v59_v41, %v59_v41  ;;  %v71_v56 = vld [vmem:[#allocation2] sm:$0x3] }
   0xb   :  { %v34_v39 = vadd.f32 %v32_v30, %v27_v33  ;;  %v67_v53 = vmul.f32 %v66_v46, %v66_v46 }
   0xc   :  { %v56_v42 = vadd.f32 %v54_v29, %v49_v36 }
   0xd   :  { %v41_v44 = vadd.f32 %v39_v34, %v34_v39 }
   0xe   :  { %v63_v47 = vadd.f32 %v61_v37, %v56_v42 }
   0xf   :  { %v48_v49 = vadd.f32 %v46_v40, %v41_v44 }
  0x10   :  { %v70_v51 = vadd.f32 %v68_v43, %v63_v47 }
  0x11   :  { %v55_v52 = vadd.f32 %v53_v45, %v48_v49 }
  0x12   :  { %v75_v54 = vadd.f32 %v74_v48, %v70_v51 }
  0x13   :  { %v62_v55 = vadd.f32 %v60_v50, %v55_v52 }
  0x14   :  { %76 = vst [vmem:[#allocation3] sm:$0x3] %v75_v54 }
  0x15   :  { %v69_v57 = vadd.f32 %v67_v53, %v62_v55 }
  0x17   :  { %v72_v58 = vadd.f32 %v71_v56, %v69_v57 }
  0x19   :  { %73 = vst [vmem:[#allocation2] sm:$0x3] %v72_v58 }
  0x1b   :  { %v85_v59 = vld [vmem:[#allocation3] sm:$0x3] }
  0x1c   :  { %v86_v60 = vsel %vm81_vm0, %v85_v59, 0.0 }
  0x1d   :  { %87 = vadd.xlane.f32.xlu0 %v86_v60 }
  0x20   :  { %v80_v61 = vld [vmem:[#allocation2] sm:$0x3] }
  0x21   :  { %v82_v62 = vsel %vm81_vm0, %v80_v61, 0.0 }
  0x25   :  { %83 = vadd.xlane.f32.xlu0 %v82_v62 }
  0x90   :  { %v88_v63 = vpop.xlane.xlu0 %87 }
  0x91   :  { %111 = vrcp.f32 %v88_v63  ;;  %v100_v3 = vand.u32 2147483648, %v88_v63  ;;  %v98_v5 = vand.u32 2147483647, %v88_v63  ;;  %vm94_vm2 = vweird.f32 %v88_v63 }
  0x93   :  { %v101_v7 = vor.u32 1.1754944e-38, %v100_v3  ;;  %vm99_vm4 = vcmp.eq.f32.partialorder %v98_v5, 8.507059e+37 }
  0x97   :  { %v112_v0 = vpop.eup %111 }
  0x98   :  { %v90_v1 = vmul.f32 %v112_v0, %v88_v63  ;;  %vm95_vm1 = vweird.f32 %v112_v0  ;;  %v84_v8 = vpop.xlane.xlu0 %83 }
  0x99   :  { %vm96_vm3 = vmor %vm94_vm2, %vm95_vm1 }
  0x9a   :  { %v91_v2 = vsub.f32 1.0, %v90_v1 }
  0x9c   :  { %v92_v4 = vmul.f32 %v112_v0, %v91_v2 }
  0x9e   :  { %v93_v6 = vadd.f32 %v112_v0, %v92_v4 }
  0xa0   :  { %v97_v9 = vsel %vm96_vm3, %v112_v0, %v93_v6 }
  0xa1   :  { %v102_v10 = vsel %vm99_vm4, %v101_v7, %v97_v9 }
  0xa2   :  { %v103_v11 = vmul.f32 %v102_v10, %v84_v8 }
  0xa4   :  { %105 = vst.msk [vmem:[%s182_s2] sm:$0x3] %vm104_vm5, %v103_v11 }

</bundles_post_ra>
